<compile_context>
chip_gen: v7x
topology: tpu7x:2x2x1
jax: 0.10.0
libtpu: 0.0.40
codegen_flags: <defaults>
</compile_context>

<pallas_src>
import functools

import jax
import jax.numpy as jnp
from jax.experimental import pallas as pl
from jax.experimental.pallas import tpu as pltpu

EPS = 1e-5

# Tile caps — safe across v5e / v6e / v7x (see header comment).
TM_MAX = 512
TN_MAX = 256
TK_MAX = 512


def _round_up(x, m):
    return (x + m - 1) // m * m


def _pick_tile(padded_dim, max_tile, align):
    """Largest multiple of `align` that is <= max_tile and divides padded_dim."""
    t = min(max_tile, padded_dim)
    t = max(align, (t // align) * align)
    while padded_dim % t != 0:
        t -= align
    return t


# ----------------------------- Pallas kernels ------------------------------ #

def _mm_relu_kernel(a_ref, w_ref, o_ref, acc_ref):
    # Tiled matmul with fused ReLU epilogue (embed conv, no BN). bf16 in, bf16 out.
    k = pl.program_id(2)

    @pl.when(k == 0)
    def _():
        acc_ref[...] = jnp.zeros_like(acc_ref)

    acc_ref[...] += jnp.dot(a_ref[...], w_ref[...],
                            preferred_element_type=jnp.float32)

    @pl.when(k == pl.num_programs(2) - 1)
    def _():
        o_ref[...] = jnp.maximum(acc_ref[...], 0.0).astype(o_ref.dtype)


def _mm_stats_kernel(a_ref, w_ref, y_ref, st_ref, acc_ref):
    # Tiled matmul; epilogue emits the raw f32 tile plus per-tile column
    # sum / sum-of-squares so BN stats can be reduced exactly across M tiles.
    k = pl.program_id(2)

    @pl.when(k == 0)
    def _():
        acc_ref[...] = jnp.zeros_like(acc_ref)

    acc_ref[...] += jnp.dot(a_ref[...], w_ref[...],
                            preferred_element_type=jnp.float32)

    @pl.when(k == pl.num_programs(2) - 1)
    def _():
        y = acc_ref[...]
        y_ref[...] = y
        s = jnp.sum(y, axis=0, keepdims=True)
        ss = jnp.sum(y * y, axis=0, keepdims=True)
        st_ref[...] = jnp.concatenate([s, ss], axis=0)[None]


def _mm_bias_kernel(a_ref, w_ref, b_ref, o_ref, acc_ref):
    # Tiled matmul + bias (classifier).
    k = pl.program_id(2)

    @pl.when(k == 0)
    def _():
        acc_ref[...] = jnp.zeros_like(acc_ref)

    acc_ref[...] += jnp.dot(a_ref[...], w_ref[...],
                            preferred_element_type=jnp.float32)

    @pl.when(k == pl.num_programs(2) - 1)
    def _():
        o_ref[...] = acc_ref[...] + b_ref[...]


def _bn_affine_kernel(y_ref, s_ref, b_ref, o_ref, *, relu):
    # y * scale + shift (+ReLU), tiled elementwise pass; bf16 out.
    y = y_ref[...] * s_ref[...] + b_ref[...]
    if relu:
        y = jnp.maximum(y, 0.0)
    o_ref[...] = y.astype(o_ref.dtype)


def _bn_affine_res_kernel(y_ref, s_ref, b_ref, r_ref, rs_ref, rb_ref, o_ref):
    # Fused: BN2 affine + BN_shortcut affine + residual add + ReLU in one pass.
    y = y_ref[...] * s_ref[...] + b_ref[...]
    r = r_ref[...] * rs_ref[...] + rb_ref[...]
    o_ref[...] = jnp.maximum(y + r, 0.0).astype(o_ref.dtype)


def _ce_loss_kernel(z_ref, onehot_ref, w_ref, o_ref):
    z = z_ref[...]
    m = jnp.max(z, axis=-1, keepdims=True)
    lse = m + jnp.log(jnp.sum(jnp.exp(z - m), axis=-1, keepdims=True))
    tgt = jnp.sum(z * onehot_ref[...], axis=-1, keepdims=True)
    o_ref[...] = jnp.sum((lse - tgt) * w_ref[...], axis=(0, 1), keepdims=True)


# ----------------------------- pallas_call glue ----------------------------- #

def _mm_common(mp, kp, np_):
    tm = _pick_tile(mp, TM_MAX, 8)
    tn = _pick_tile(np_, TN_MAX, 128)
    tk = _pick_tile(kp, TK_MAX, 128)
    grid = (mp // tm, np_ // tn, kp // tk)
    a_spec = pl.BlockSpec((tm, tk), lambda i, j, k: (i, k))
    w_spec = pl.BlockSpec((tk, tn), lambda i, j, k: (k, j))
    o_spec = pl.BlockSpec((tm, tn), lambda i, j, k: (i, j))
    cparams = pltpu.CompilerParams(
        dimension_semantics=("parallel", "parallel", "arbitrary"))
    return tm, tn, tk, grid, a_spec, w_spec, o_spec, cparams


def matmul_relu(a, w):
    mp, kp = a.shape
    _, np_ = w.shape
    tm, tn, _, grid, a_spec, w_spec, o_spec, cparams = _mm_common(mp, kp, np_)
    return pl.pallas_call(
        _mm_relu_kernel,
        out_shape=jax.ShapeDtypeStruct((mp, np_), jnp.bfloat16),
        grid_spec=pltpu.PrefetchScalarGridSpec(
            num_scalar_prefetch=0, grid=grid,
            in_specs=[a_spec, w_spec], out_specs=o_spec,
            scratch_shapes=[pltpu.VMEM((tm, tn), jnp.float32)]),
        compiler_params=cparams,
        cost_estimate=pl.CostEstimate(
            flops=2 * mp * np_ * kp, transcendentals=0,
            bytes_accessed=2 * mp * kp + 2 * kp * np_ + 2 * mp * np_),
    )(a, w)


def matmul_stats(a, w):
    mp, kp = a.shape
    _, np_ = w.shape
    tm, tn, _, grid, a_spec, w_spec, o_spec, cparams = _mm_common(mp, kp, np_)
    nmt = mp // tm
    st_spec = pl.BlockSpec((1, 2, tn), lambda i, j, k: (i, 0, j))
    y, stats = pl.pallas_call(
        _mm_stats_kernel,
        out_shape=(jax.ShapeDtypeStruct((mp, np_), jnp.float32),
                   jax.ShapeDtypeStruct((nmt, 2, np_), jnp.float32)),
        grid_spec=pltpu.PrefetchScalarGridSpec(
            num_scalar_prefetch=0, grid=grid,
            in_specs=[a_spec, w_spec], out_specs=[o_spec, st_spec],
            scratch_shapes=[pltpu.VMEM((tm, tn), jnp.float32)]),
        compiler_params=cparams,
        cost_estimate=pl.CostEstimate(
            flops=2 * mp * np_ * kp, transcendentals=0,
            bytes_accessed=2 * mp * kp + 2 * kp * np_ + 4 * mp * np_),
    )(a, w)
    return y, stats


def matmul_bias(a, w, b):
    mp, kp = a.shape
    _, np_ = w.shape
    tm, tn, _, grid, a_spec, w_spec, o_spec, cparams = _mm_common(mp, kp, np_)
    b_spec = pl.BlockSpec((1, tn), lambda i, j, k: (0, j))
    return pl.pallas_call(
        _mm_bias_kernel,
        out_shape=jax.ShapeDtypeStruct((mp, np_), jnp.float32),
        grid_spec=pltpu.PrefetchScalarGridSpec(
            num_scalar_prefetch=0, grid=grid,
            in_specs=[a_spec, w_spec, b_spec], out_specs=o_spec,
            scratch_shapes=[pltpu.VMEM((tm, tn), jnp.float32)]),
        compiler_params=cparams,
        cost_estimate=pl.CostEstimate(
            flops=2 * mp * np_ * kp, transcendentals=0,
            bytes_accessed=2 * mp * kp + 2 * kp * np_ + 4 * mp * np_),
    )(a, w, b)


def bn_affine(y, scale, shift, *, relu, residual=None, res_scale=None, res_shift=None):
    mp, np_ = y.shape
    tm = _pick_tile(mp, TM_MAX, 8)
    tn = _pick_tile(np_, TN_MAX, 128)
    grid = (mp // tm, np_ // tn)
    t_spec = pl.BlockSpec((tm, tn), lambda i, j: (i, j))
    v_spec = pl.BlockSpec((1, tn), lambda i, j: (0, j))
    cparams = pltpu.CompilerParams(dimension_semantics=("parallel", "parallel"))
    out_shape = jax.ShapeDtypeStruct((mp, np_), jnp.bfloat16)
    if residual is None:
        return pl.pallas_call(
            functools.partial(_bn_affine_kernel, relu=relu),
            out_shape=out_shape, grid=grid,
            in_specs=[t_spec, v_spec, v_spec], out_specs=t_spec,
            compiler_params=cparams,
        )(y, scale, shift)
    return pl.pallas_call(
        _bn_affine_res_kernel,
        out_shape=out_shape, grid=grid,
        in_specs=[t_spec, v_spec, v_spec, t_spec, v_spec, v_spec],
        out_specs=t_spec, compiler_params=cparams,
    )(y, scale, shift, residual, res_scale, res_shift)


def _full_spec(shape):
    nd = len(shape)
    return pl.BlockSpec(shape, lambda i, _nd=nd: (0,) * _nd)


def ce_loss(logits, onehot, wts):
    out = pl.pallas_call(
        _ce_loss_kernel,
        out_shape=jax.ShapeDtypeStruct((1, 1), jnp.float32),
        grid=(1,),
        in_specs=[_full_spec(logits.shape), _full_spec(onehot.shape),
                  _full_spec(wts.shape)],
        out_specs=_full_spec((1, 1)),
    )(logits, onehot, wts)
    return out[0, 0]


# ------------------------------ conv helpers -------------------------------- #

def _im2col(x_nhwc, kh, kw, stride, pad):
    # TODO(synk): fold this gather into the conv kernel's index_map / strided DMA.
    n, h, w, c = x_nhwc.shape
    xp = jnp.pad(x_nhwc, ((0, 0), (pad, pad), (pad, pad), (0, 0)))
    ho = (h + 2 * pad - kh) // stride + 1
    wo = (w + 2 * pad - kw) // stride + 1
    cols = []
    for i in range(kh):
        for j in range(kw):
            cols.append(xp[:, i:i + stride * ho:stride, j:j + stride * wo:stride, :])
    p = jnp.stack(cols, axis=3)                       # (n, ho, wo, kh*kw, c)
    return p.reshape(n * ho * wo, kh * kw * c), (n, ho, wo)


def _conv_operand(x_nhwc, kh, kw, stride, pad, kp):
    a, (n, ho, wo) = _im2col(x_nhwc, kh, kw, stride, pad)
    m, k = a.shape
    mp = _round_up(m, 8)
    if mp != m or kp != k:
        a = jnp.pad(a, ((0, mp - m), (0, kp - k)))
    return a, (n, ho, wo, m)


def conv_relu(x_nhwc, wp, cout, kh, kw, stride, pad):
    a, (n, ho, wo, m) = _conv_operand(x_nhwc, kh, kw, stride, pad, wp.shape[0])
    h = matmul_relu(a, wp)
    return h[:m, :cout].reshape(n, ho, wo, cout)


def conv_bn_raw(x_nhwc, wp, kh, kw, stride, pad):
    a, meta = _conv_operand(x_nhwc, kh, kw, stride, pad, wp.shape[0])
    y, stats = matmul_stats(a, wp)
    return y, stats, meta


def _bn_scale_shift(stats, m_valid, gamma_pad, beta_pad):
    # Exact cross-tile BN stats from per-tile sums (biased var, as torch BN train).
    tot = jnp.sum(stats, axis=0)                      # (2, Np)
    mean = tot[0] / m_valid
    var = jnp.maximum(tot[1] / m_valid - mean * mean, 0.0)
    scale = gamma_pad * jax.lax.rsqrt(var + EPS)
    shift = beta_pad - mean * scale
    return scale[None, :].astype(jnp.float32), shift[None, :].astype(jnp.float32)


# ------------------------------- parameters --------------------------------- #

def init_params(key, in_channels=3, n_classes=10, n_layers=3, height=32, width=32):
    def conv_w(k, cout, cin, kh, kw):
        fan_in = cin * kh * kw
        return jax.random.normal(k, (cout, cin, kh, kw), jnp.float32) / jnp.sqrt(fan_in)

    keys = iter(jax.random.split(key, 4 + 4 * n_layers))
    params = {"embed": conv_w(next(keys), 64, in_channels, 3, 3), "layers": []}
    h, w = height, width
    for l in range(n_layers):
        cin, cout = 64 * 2 ** l, 64 * 2 ** (l + 1)
        params["layers"].append({
            "conv1": conv_w(next(keys), cout, cin, 3, 3),
            "bn1_g": jnp.ones((cout,), jnp.float32), "bn1_b": jnp.zeros((cout,), jnp.float32),
            "conv2": conv_w(next(keys), cout, cout, 3, 3),
            "bn2_g": jnp.ones((cout,), jnp.float32), "bn2_b": jnp.zeros((cout,), jnp.float32),
            "sc_conv": conv_w(next(keys), cout, cin, 1, 1),
            "bn_sc_g": jnp.ones((cout,), jnp.float32), "bn_sc_b": jnp.zeros((cout,), jnp.float32),
        })
        h, w = (h + 1) // 2, (w + 1) // 2
    n_features = 64 * 2 ** n_layers * h * w
    params["fc_w"] = (jax.random.normal(next(keys), (n_features, n_classes), jnp.float32)
                      / jnp.sqrt(n_features))
    params["fc_b"] = jax.random.normal(next(keys), (1, n_classes), jnp.float32) * 0.01
    return params


def prepare_params(params, height, width):
    """One-time: pad/transposed bf16 weight matrices, padded BN vectors, permuted fc."""
    def prep_w(w_torch):
        cout, cin, kh, kw = w_torch.shape
        k = kh * kw * cin
        kp, np_ = _round_up(k, 128), _round_up(cout, 128)
        wm = jnp.transpose(w_torch, (2, 3, 1, 0)).reshape(k, cout)
        return jnp.pad(wm, ((0, kp - k), (0, np_ - cout))).astype(jnp.bfloat16)

    def prep_vec(v):
        np_ = _round_up(v.shape[0], 128)
        return jnp.pad(v.astype(jnp.float32), (0, np_ - v.shape[0]))

    prep = {"embed_w": prep_w(params["embed"]),
            "embed_cout": int(params["embed"].shape[0]),
            "layers": []}
    h, w = height, width
    for lp in params["layers"]:
        prep["layers"].append({
            "cout": int(lp["conv1"].shape[0]),
            "w1": prep_w(lp["conv1"]), "g1": prep_vec(lp["bn1_g"]), "b1": prep_vec(lp["bn1_b"]),
            "w2": prep_w(lp["conv2"]), "g2": prep_vec(lp["bn2_g"]), "b2": prep_vec(lp["bn2_b"]),
            "wsc": prep_w(lp["sc_conv"]), "gsc": prep_vec(lp["bn_sc_g"]), "bsc": prep_vec(lp["bn_sc_b"]),
        })
        h, w = (h + 1) // 2, (w + 1) // 2
    n_layers = len(params["layers"])
    c_f = 64 * 2 ** n_layers
    n_feat, n_cls = params["fc_w"].shape
    # Fold torch's NCHW flatten into fc_w's row order (CHW -> HWC), so the
    # activation can be flattened in NHWC order without a transpose pass.
    fc_hwc = params["fc_w"].reshape(c_f, h, w, n_cls).transpose(1, 2, 0, 3).reshape(n_feat, n_cls)
    kp, np_ = _round_up(n_feat, 128), _round_up(n_cls, 128)
    prep["fc_w"] = jnp.pad(fc_hwc, ((0, kp - n_feat), (0, np_ - n_cls))).astype(jnp.bfloat16)
    prep["fc_b"] = jnp.pad(params["fc_b"].reshape(1, n_cls).astype(jnp.float32),
                           ((0, 0), (0, np_ - n_cls)))
    prep["n_classes"] = n_cls
    return prep


# --------------------------------- forward ---------------------------------- #

def resnet_forward(params, x_nchw, y=None, sample_weight=None, prepared=None):
    if prepared is None:
        prepared = prepare_params(params, x_nchw.shape[2], x_nchw.shape[3])

    x = jnp.transpose(x_nchw, (0, 2, 3, 1)).astype(jnp.bfloat16)   # NCHW -> NHWC, bf16

    h = conv_relu(x, prepared["embed_w"], prepared["embed_cout"], 3, 3, 1, 1)

    for lp in prepared["layers"]:
        cout = lp["cout"]
        # conv1 (3x3, stride 2) -> BN -> ReLU
        y1, st1, (n, ho, wo, m) = conv_bn_raw(h, lp["w1"], 3, 3, 2, 1)
        s1, b1 = _bn_scale_shift(st1, m, lp["g1"], lp["b1"])
        h1p = bn_affine(y1, s1, b1, relu=True)
        h1 = h1p[:m, :cout].reshape(n, ho, wo, cout)
        # conv2 (3x3, stride 1) and shortcut (1x1, stride 2); BN affines + residual
        # add + ReLU are fused into a single elementwise pass.
        y2, st2, _ = conv_bn_raw(h1, lp["w2"], 3, 3, 1, 1)
        s2, b2 = _bn_scale_shift(st2, m, lp["g2"], lp["b2"])
        ysc, stsc, _ = conv_bn_raw(h, lp["wsc"], 1, 1, 2, 0)
        ssc, bsc = _bn_scale_shift(stsc, m, lp["gsc"], lp["bsc"])
        hp = bn_affine(y2, s2, b2, relu=True,
                       residual=ysc, res_scale=ssc, res_shift=bsc)
        h = hp[:m, :cout].reshape(n, ho, wo, cout)

    # classifier (flatten permutation already folded into fc_w)
    n_b = h.shape[0]
    feats = h.reshape(n_b, -1)
    kp, _ = prepared["fc_w"].shape
    mp = _round_up(n_b, 8)
    feats = jnp.pad(feats, ((0, mp - n_b), (0, kp - feats.shape[1])))
    logits_p = matmul_bias(feats, prepared["fc_w"], prepared["fc_b"])
    n_cls = prepared["n_classes"]
    logits = logits_p[:n_b, :n_cls]

    loss = None
    if y is not None:
        onehot = jax.nn.one_hot(y, n_cls, dtype=jnp.float32)
        if sample_weight is None:
            wts = jnp.full((n_b, 1), 1.0 / n_b, jnp.float32)          # mean reduction
        else:
            wts = sample_weight.reshape(n_b, 1).astype(jnp.float32)   # weighted sum
        loss = ce_loss(logits, onehot, wts)
    return loss, logits


# ------------------------- pure-JAX reference (check) ------------------------ #

def _ref_forward(params, x_nchw):
    # Matches the kernel pipeline's precision choices: bf16 MXU inputs, f32 accumulate,
    # BN / elementwise in f32.
    def conv(xh, w_torch, stride, pad):
        w = jnp.transpose(w_torch, (2, 3, 1, 0)).astype(jnp.bfloat16)   # HWIO
        return jax.lax.conv_general_dilated(
            xh.astype(jnp.bfloat16), w, (stride, stride), [(pad, pad), (pad, pad)],
            dimension_numbers=("NHWC", "HWIO", "NHWC"),
            preferred_element_type=jnp.float32)

    def bn(z, g, b):
        m = jnp.mean(z, axis=(0, 1, 2), keepdims=True)
        v = jnp.mean(jnp.square(z - m), axis=(0, 1, 2), keepdims=True)
        return (z - m) * jax.lax.rsqrt(v + EPS) * g + b

    xh = jnp.transpose(x_nchw, (0, 2, 3, 1))
    h = jax.nn.relu(conv(xh, params["embed"], 1, 1))
    for lp in params["layers"]:
        h1 = jax.nn.relu(bn(conv(h, lp["conv1"], 2, 1), lp["bn1_g"], lp["bn1_b"]))
        b2 = bn(conv(h1, lp["conv2"], 1, 1), lp["bn2_g"], lp["bn2_b"])
        sc = bn(conv(h, lp["sc_conv"], 2, 0), lp["bn_sc_g"], lp["bn_sc_b"])
        h = jax.nn.relu(sc + b2)
    feats = jnp.transpose(h, (0, 3, 1, 2)).reshape(h.shape[0], -1)
    logits = jnp.dot(feats.astype(jnp.bfloat16), params["fc_w"].astype(jnp.bfloat16),
                     preferred_element_type=jnp.float32) + params["fc_b"]
    return logits


# ----------------------------------- main ------------------------------------ #

if __name__ == "__main__":
    key = jax.random.PRNGKey(0)
    k_param, k_x, k_y, k_w = jax.random.split(key, 4)

    B, C_IN, H, W = 2, 3, 16, 16
    N_LAYERS, N_CLASSES = 2, 10

    params = init_params(k_param, in_channels=C_IN, n_classes=N_CLASSES,
                         n_layers=N_LAYERS, height=H, width=W)
    prepared = prepare_params(params, H, W)      # hoisted out of the forward path

    x = jax.random.normal(k_x, (B, C_IN, H, W), jnp.float32)
    y = jax.random.randint(k_y, (B,), 0, N_CLASSES)
    sw = jax.nn.softmax(jax.random.normal(k_w, (B,), jnp.float32))

    # forward without labels -> (None, logits)
    loss0, logits = resnet_forward(params, x, prepared=prepared)
    jax.block_until_ready(logits)
    assert loss0 is None and logits.shape == (B, N_CLASSES)

    # forward with labels (mean CE) and with sample weights (weighted sum)
    loss_mean, _ = resnet_forward(params, x, y=y, prepared=prepared)
    loss_wtd, _ = resnet_forward(params, x, y=y, sample_weight=sw, prepared=prepared)
    jax.block_until_ready((loss_mean, loss_wtd))
    assert bool(jnp.isfinite(loss_mean)) and bool(jnp.isfinite(loss_wtd))

    # correctness check vs pure-JAX reference at matched (bf16-input) precision
    ref_logits = _ref_forward(params, x)
    max_err = float(jnp.max(jnp.abs(logits - ref_logits)))
    assert jnp.allclose(logits, ref_logits, rtol=2e-2, atol=2e-2), max_err

    print("KERNEL_OK")
</pallas_src>

<mosaic_0001>
module attributes {stable_mosaic.version = 11 : i64} {
  func.func @_mm_relu_kernel(%arg0: i32, %arg1: i32, %arg2: i32, %arg3: memref<512x128xbf16, #tpu.memory_space<vmem>>, %arg4: memref<128x128xbf16, #tpu.memory_space<vmem>>, %arg5: memref<512x128xbf16, #tpu.memory_space<vmem>>, %arg6: memref<512x128xf32, #tpu.memory_space<vmem>>) attributes {dimension_semantics = [#tpu.dimension_semantics<parallel>, #tpu.dimension_semantics<parallel>, #tpu.dimension_semantics<arbitrary>], iteration_bounds = array<i64: 1, 1, 1>, scalar_prefetch = 0 : i64, scratch_operands = 1 : i64, tpu.core_type = #tpu.core_type<tc>, window_params = [{transform_indices = @transform_0, window_bounds = array<i64: 512, 128>}, {transform_indices = @transform_1, window_bounds = array<i64: 128, 128>}, {transform_indices = @transform_2, window_bounds = array<i64: 512, 128>}]} {
    %c0_i32 = arith.constant 0 : i32
    %0 = arith.cmpi eq, %arg2, %c0_i32 : i32
    %1 = arith.extui %0 : i1 to i32
    %c0_i32_0 = arith.constant 0 : i32
    %2 = arith.cmpi ne, %1, %c0_i32_0 : i32
    scf.if %2 {
      %cst_10 = arith.constant 0.000000e+00 : f32
      %12 = vector.broadcast %cst_10 : f32 to vector<512x128xf32>
      %c0_11 = arith.constant 0 : index
      %c0_12 = arith.constant 0 : index
      %13 = vector.load %arg6[%c0_11, %c0_12] : memref<512x128xf32, #tpu.memory_space<vmem>>, vector<512x128xf32>
      tpu.vector_store %arg6[%c0_11, %c0_12], %12 {strides = array<i32>} : memref<512x128xf32, #tpu.memory_space<vmem>>, vector<512x128xf32>,
    } else {
    }
    %c0 = arith.constant 0 : index
    %c0_1 = arith.constant 0 : index
    %3 = vector.load %arg6[%c0, %c0_1] : memref<512x128xf32, #tpu.memory_space<vmem>>, vector<512x128xf32>
    %c0_2 = arith.constant 0 : index
    %c0_3 = arith.constant 0 : index
    %4 = vector.load %arg3[%c0_2, %c0_3] : memref<512x128xbf16, #tpu.memory_space<vmem>>, vector<512x128xbf16>
    %c0_4 = arith.constant 0 : index
    %c0_5 = arith.constant 0 : index
    %5 = vector.load %arg4[%c0_4, %c0_5] : memref<128x128xbf16, #tpu.memory_space<vmem>>, vector<128x128xbf16>
    %cst = arith.constant dense<0.000000e+00> : vector<512x128xf32>
    %6 = tpu.matmul %4, %5, %cst {dimension_numbers = #tpu.dot_dimension_numbers<[1], [0], [0], [1], [0, 0, 1, 1], [], []>} : vector<512x128xbf16>, vector<128x128xbf16>, vector<512x128xf32> -> vector<512x128xf32>
    %7 = arith.addf %3, %6 : vector<512x128xf32>
    %c0_6 = arith.constant 0 : index
    %c0_7 = arith.constant 0 : index
    %8 = vector.load %arg6[%c0_6, %c0_7] : memref<512x128xf32, #tpu.memory_space<vmem>>, vector<512x128xf32>
    tpu.vector_store %arg6[%c0_6, %c0_7], %7 {strides = array<i32>} : memref<512x128xf32, #tpu.memory_space<vmem>>, vector<512x128xf32>,
    %c0_i32_8 = arith.constant 0 : i32
    %9 = arith.cmpi eq, %arg2, %c0_i32_8 : i32
    %10 = arith.extui %9 : i1 to i32
    %c0_i32_9 = arith.constant 0 : i32
    %11 = arith.cmpi ne, %10, %c0_i32_9 : i32
    scf.if %11 {
      %c0_10 = arith.constant 0 : index
      %c0_11 = arith.constant 0 : index
      %12 = vector.load %arg6[%c0_10, %c0_11] : memref<512x128xf32, #tpu.memory_space<vmem>>, vector<512x128xf32>
      %cst_12 = arith.constant 0.000000e+00 : f32
      %13 = vector.broadcast %cst_12 : f32 to vector<512x128xf32>
      %14 = arith.maximumf %12, %13 : vector<512x128xf32>
      %15 = arith.truncf %14 : vector<512x128xf32> to vector<512x128xbf16>
      %c0_13 = arith.constant 0 : index
      %c0_14 = arith.constant 0 : index
      %16 = vector.load %arg5[%c0_13, %c0_14] : memref<512x128xbf16, #tpu.memory_space<vmem>>, vector<512x128xbf16>
      tpu.vector_store %arg5[%c0_13, %c0_14], %15 {strides = array<i32>} : memref<512x128xbf16, #tpu.memory_space<vmem>>, vector<512x128xbf16>,
    } else {
    }
    return
  }
  func.func @transform_0(%arg0: i32, %arg1: i32, %arg2: i32) -> (i32, i32) {
    %c0_i32 = arith.constant 0 : i32
    return %arg0, %arg2 : i32, i32
  }
  func.func @transform_1(%arg0: i32, %arg1: i32, %arg2: i32) -> (i32, i32) {
    %c0_i32 = arith.constant 0 : i32
    return %arg2, %arg1 : i32, i32
  }
  func.func @transform_2(%arg0: i32, %arg1: i32, %arg2: i32) -> (i32, i32) {
    %c0_i32 = arith.constant 0 : i32
    return %arg0, %arg1 : i32, i32
  }
}

</mosaic_0001>

<bundles_post_ra>
// kernel: tpu_custom_call.1
= control target key start
LH: loop header
LB: loop body
LE: loop exit
PB: predicated region body
PF: predicated region fallthrough
CT: control target
= control target key end

     0   :  { %7 = vsyncpa [#allocation4], 0  ;;  %s2056_s0 = inlined_call_operand.hbm [shape: bf16[512,128], index: 0, kind: input, shape index: {}]   ;;  %s2057_s1 = inlined_call_operand.hbm [shape: bf16[128,128], index: 1, kind: input, shape index: {}]   ;;  %s2058_s2 = inlined_call_operand.hbm [shape: bf16[512,128], index: 2, kind: output, shape index: {}]  }
   0x1   :  { %8 = vsyncpa [#allocation7], 0 }
   0x2   :  { %9 = vsyncpa [#allocation5], 0  ;;  %s1991_s9 = smov [#allocation3]   ;;  %s1919_s13 = scalar_lea.hbm %s2056_s0, 4096 }
   0x3   :  { %s15_s10 = sshll.u32 %s1991_s9, 4  ;;  %p1920_p0 = scmp.ne.s32.totalorder %s2056_s0, %s1919_s13  ;;  %s16_s10 = int_to_ptr.vmem [resolvable:$true] %s15_s10 }
   0x4   :  { %p1923_p1 = scmp.lt.u32.totalorder %s1919_s13, %s2056_s0 }
   0x6   :  { %p1925_p2 = pnand %p1923_p1, %p1920_p0 }
   0x8   :  { %1928 = shalt.err (!%p1925_p2)
}
   0x9   :  { %s1929_s18 = scalar_lea.vmem %s16_s10, 4096  ;;  %p1934_p4 = scmp.lt.s32.totalorder %s16_s10, %s16_s10 }
   0xa   :  { %p1930_p3 = scmp.ne.s32.totalorder %s16_s10, %s1929_s18  ;;  %p1935_p5 = scmp.lt.s32.totalorder %s1929_s18, %s1929_s18 }
   0xc   :  { %p1936_p6 = por %p1935_p5, %p1934_p4 }
   0xe   :  { %p1937_p7 = pnand %p1936_p6, %p1930_p3 }
  0x10   :  { %1940 = shalt.err (!%p1937_p7)
}
  0x11   :  { %s1992_s19 = smov 64   ;;  %s1993_s20 = smov 4  }
  0x12   :  { %21 = dma.hbm_to_vmem [thread:$0]  %s2056_s0, 4096, %s16_s10, [#allocation4], %s1992_s19, %s1992_s19, %s1993_s20  }
  0x13   :  { %s1994_s23 = smov [#allocation6]   ;;  %s1941_s27 = scalar_lea.hbm %s2057_s1, 1024 }
  0x14   :  { %s27_s24 = sshll.u32 %s1994_s23, 4  ;;  %p1942_p8 = scmp.ne.s32.totalorder %s2057_s1, %s1941_s27  ;;  %s28_s24 = int_to_ptr.vmem [resolvable:$true] %s27_s24 }
  0x15   :  { %p1945_p9 = scmp.lt.u32.totalorder %s1941_s27, %s2057_s1 }
  0x17   :  { %p1947_p10 = pnand %p1945_p9, %p1942_p8 }
  0x19   :  { %1950 = shalt.err (!%p1947_p10)
}
  0x1a   :  { %s1951_s4 = scalar_lea.vmem %s28_s24, 1024  ;;  %p1956_p12 = scmp.lt.s32.totalorder %s28_s24, %s28_s24 }
  0x1b   :  { %p1952_p11 = scmp.ne.s32.totalorder %s28_s24, %s1951_s4  ;;  %p1957_p13 = scmp.lt.s32.totalorder %s1951_s4, %s1951_s4 }
  0x1d   :  { %p1958_p0 = por %p1957_p13, %p1956_p12 }
  0x1f   :  { %p1959_p1 = pnand %p1958_p0, %p1952_p11 }
  0x21   :  { %1962 = shalt.err (!%p1959_p1)
}
  0x22   :  { %33 = dma.hbm_to_vmem [thread:$0]  %s2057_s1, 1024, %s28_s24, [#allocation7], %s1992_s19, %s1992_s19, %s1993_s20  }
  0x23   :  { %1985 = dma.done.wait [#allocation4], 4096  }
  0x24   :  { %1986 = vsyncadd [#allocation4], 4294963200 }
  0x25   :  { %1987 = dma.done.wait [#allocation7], 1024  }
  0x26   :  { %1988 = vsyncadd [#allocation7], 4294966272  ;;  %v1879_v0 = vld [vmem:[#allocation6] sm:$0xff]   ;;  %v1880_v1 = vld [vmem:[#allocation6 + $0x8] sm:$0xff]   ;;  %s1995_s1 = smov [#allocation8]  }
  0x27   :  { %1778 = vmatprep.subr.bf16.mxu0 %v1879_v0  ;;  %1858 = vmatprep.subr.bf16.mxu1 %v1879_v0  ;;  %v1881_v2 = vld [vmem:[#allocation6 + $0x10] sm:$0xff]   ;;  %v1882_v3 = vld [vmem:[#allocation6 + $0x18] sm:$0xff]   ;;  %v1887_v4 = vld [vmem:[#allocation3] sm:$0xff]   ;;  %s1366_s6 = sshll.u32 %s1995_s1, 4  ;;  %s1367_s6 = int_to_ptr.vmem [resolvable:$true] %s1366_s6 }
  0x28   :  { %1779 = vmatpush3.bf16.msra.mxu0 %v1879_v0  ;;  %1866 = vmatpush3.bf16.msra.mxu1 %v1879_v0  ;;  %v1888_v5 = vld [vmem:[#allocation3 + $0x80] sm:$0xff]   ;;  %v1884_v7 = vld [vmem:[#allocation6 + $0x28] sm:$0xff]   ;;  %v1885_v8 = vld [vmem:[#allocation6 + $0x30] sm:$0xff]   ;;  %s1963_s7 = scalar_lea.vmem %s1367_s6, 4096  ;;  %p1968_p3 = scmp.lt.s32.totalorder %s1367_s6, %s1367_s6 }
  0x29   :  { %1780 = vmatprep.subr.bf16.mxu0 %v1880_v1  ;;  %1859 = vmatprep.subr.bf16.mxu1 %v1880_v1  ;;  %v1883_v6 = vld [vmem:[#allocation6 + $0x20] sm:$0xff]   ;;  %v1886_v9 = vld [vmem:[#allocation6 + $0x38] sm:$0xff]   ;;  %v1889_v10 = vld [vmem:[#allocation3 + $0x8] sm:$0xff]   ;;  %p1964_p2 = scmp.ne.s32.totalorder %s1367_s6, %s1963_s7  ;;  %p1969_p4 = scmp.lt.s32.totalorder %s1963_s7, %s1963_s7 }
  0x2a   :  { %1794 = vmatprep.mubr.bf16.mxu0 %v1887_v4  ;;  %1826 = vmatprep.mubr.bf16.mxu1 %v1888_v5  ;;  %v1890_v11 = vld [vmem:[#allocation3 + $0x88] sm:$0xff]   ;;  %v1891_v12 = vld [vmem:[#allocation3 + $0x10] sm:$0xff]   ;;  %v1893_v14 = vld [vmem:[#allocation3 + $0x18] sm:$0xff]  }
  0x2b   :  { %v1892_v13 = vld [vmem:[#allocation3 + $0x90] sm:$0xff]   ;;  %v1894_v15 = vld [vmem:[#allocation3 + $0x98] sm:$0xff]   ;;  %v1895_v16 = vld [vmem:[#allocation3 + $0x20] sm:$0xff]   ;;  %p1970_p5 = por %p1969_p4, %p1968_p3 }
  0x2c   :  { %1781 = vmatpush3.bf16.msra.mxu0 %v1880_v1  ;;  %1867 = vmatpush3.bf16.msra.mxu1 %v1880_v1  ;;  %v1896_v17 = vld [vmem:[#allocation3 + $0xa0] sm:$0xff]   ;;  %v1897_v18 = vld [vmem:[#allocation3 + $0x28] sm:$0xff]   ;;  %v1899_v20 = vld [vmem:[#allocation3 + $0x30] sm:$0xff]  }
  0x2d   :  { %1782 = vmatprep.subr.bf16.mxu0 %v1881_v2  ;;  %1860 = vmatprep.subr.bf16.mxu1 %v1881_v2  ;;  %v1898_v19 = vld [vmem:[#allocation3 + $0xa8] sm:$0xff]   ;;  %v1900_v21 = vld [vmem:[#allocation3 + $0xb0] sm:$0xff]   ;;  %v1901_v22 = vld [vmem:[#allocation3 + $0x38] sm:$0xff]   ;;  %p1971_p6 = pnand %p1970_p5, %p1964_p2 }
  0x2e   :  { %v1902_v23 = vld [vmem:[#allocation3 + $0xb8] sm:$0xff]   ;;  %v1903_v24 = vld [vmem:[#allocation3 + $0x40] sm:$0xff]   ;;  %v1905_v26 = vld [vmem:[#allocation3 + $0x48] sm:$0xff]  }
  0x2f   :  { %v1904_v25 = vld [vmem:[#allocation3 + $0xc0] sm:$0xff]   ;;  %v1906_v27 = vld [vmem:[#allocation3 + $0xc8] sm:$0xff]   ;;  %v1907_v28 = vld [vmem:[#allocation3 + $0x50] sm:$0xff]  }
  0x30   :  { %1783 = vmatpush3.bf16.msra.mxu0 %v1881_v2  ;;  %1868 = vmatpush3.bf16.msra.mxu1 %v1881_v2  ;;  %v1908_v29 = vld [vmem:[#allocation3 + $0xd0] sm:$0xff]   ;;  %v1909_v30 = vld [vmem:[#allocation3 + $0x58] sm:$0xff]   ;;  %v1911_v32 = vld [vmem:[#allocation3 + $0x60] sm:$0xff]  }
  0x31   :  { %1784 = vmatprep.subr.bf16.mxu0 %v1882_v3  ;;  %1861 = vmatprep.subr.bf16.mxu1 %v1882_v3  ;;  %v1910_v31 = vld [vmem:[#allocation3 + $0xd8] sm:$0xff]   ;;  %v1912_v33 = vld [vmem:[#allocation3 + $0xe0] sm:$0xff]   ;;  %v1913_v34 = vld [vmem:[#allocation3 + $0x68] sm:$0xff]  }
  0x32   :  { %v1914_v35 = vld [vmem:[#allocation3 + $0xe8] sm:$0xff]   ;;  %v1915_v36 = vld [vmem:[#allocation3 + $0x70] sm:$0xff]   ;;  %v1917_v38 = vld [vmem:[#allocation3 + $0x78] sm:$0xff]  }
  0x33   :  { %v1916_v37 = vld [vmem:[#allocation3 + $0xf0] sm:$0xff]   ;;  %v1918_v39 = vld [vmem:[#allocation3 + $0xf8] sm:$0xff]  }
  0x34   :  { %1785 = vmatpush3.bf16.msra.mxu0 %v1882_v3  ;;  %1869 = vmatpush3.bf16.msra.mxu1 %v1882_v3 }
  0x35   :  { %1786 = vmatprep.subr.bf16.mxu0 %v1883_v6  ;;  %1862 = vmatprep.subr.bf16.mxu1 %v1883_v6 }
  0x38   :  { %1787 = vmatpush3.bf16.msra.mxu0 %v1883_v6  ;;  %1870 = vmatpush3.bf16.msra.mxu1 %v1883_v6 }
  0x39   :  { %1788 = vmatprep.subr.bf16.mxu0 %v1884_v7  ;;  %1863 = vmatprep.subr.bf16.mxu1 %v1884_v7 }
  0x3c   :  { %1789 = vmatpush3.bf16.msra.mxu0 %v1884_v7  ;;  %1871 = vmatpush3.bf16.msra.mxu1 %v1884_v7 }
  0x3d   :  { %1790 = vmatprep.subr.bf16.mxu0 %v1885_v8  ;;  %1864 = vmatprep.subr.bf16.mxu1 %v1885_v8 }
  0x40   :  { %1791 = vmatpush3.bf16.msra.mxu0 %v1885_v8  ;;  %1872 = vmatpush3.bf16.msra.mxu1 %v1885_v8 }
  0x41   :  { %1792 = vmatprep.subr.bf16.mxu0 %v1886_v9  ;;  %1865 = vmatprep.subr.bf16.mxu1 %v1886_v9 }
  0x44   :  { %1793 = vmatpush3.bf16.msra.mxu0 %v1886_v9  ;;  %1873 = vmatpush3.bf16.msra.mxu1 %v1886_v9 }
  0x47   :  { %1795 = vmatmul.mubr.bf16.vlgmr.msra.gmra.mrb[0].mxu0 %v1889_v10  ;;  %1827 = vmatmul.mubr.bf16.vlgmr.msra.gmra.mrb[0].mxu1 %v1890_v11 }
  0x48   :  { %1798 = vmatprep.mubr.bf16.mxu0 %v1891_v12  ;;  %1830 = vmatprep.mubr.bf16.mxu1 %v1892_v13 }
  0x4f   :  { %1799 = vmatmul.mubr.bf16.gmra.mrb[4].mxu0 %v1893_v14  ;;  %1831 = vmatmul.mubr.bf16.gmra.mrb[4].mxu1 %v1894_v15 }
  0x50   :  { %1802 = vmatprep.mubr.bf16.mxu0 %v1895_v16  ;;  %1834 = vmatprep.mubr.bf16.mxu1 %v1896_v17 }
  0x57   :  { %1803 = vmatmul.mubr.bf16.gmra.mrb[8].mxu0 %v1897_v18  ;;  %1835 = vmatmul.mubr.bf16.gmra.mrb[8].mxu1 %v1898_v19 }
  0x58   :  { %1806 = vmatprep.mubr.bf16.mxu0 %v1899_v20  ;;  %1838 = vmatprep.mubr.bf16.mxu1 %v1900_v21 }
  0x5f   :  { %1807 = vmatmul.mubr.bf16.gmra.mrb[12].mxu0 %v1901_v22  ;;  %1839 = vmatmul.mubr.bf16.gmra.mrb[12].mxu1 %v1902_v23 }
  0x60   :  { %1810 = vmatprep.mubr.bf16.mxu0 %v1903_v24  ;;  %1842 = vmatprep.mubr.bf16.mxu1 %v1904_v25 }
  0x67   :  { %1811 = vmatmul.mubr.bf16.gmra.mrb[16].mxu0 %v1905_v26  ;;  %1843 = vmatmul.mubr.bf16.gmra.mrb[16].mxu1 %v1906_v27 }
  0x68   :  { %1814 = vmatprep.mubr.bf16.mxu0 %v1907_v28  ;;  %1846 = vmatprep.mubr.bf16.mxu1 %v1908_v29 }
  0x6f   :  { %1815 = vmatmul.mubr.bf16.gmra.mrb[20].mxu0 %v1909_v30  ;;  %1847 = vmatmul.mubr.bf16.gmra.mrb[20].mxu1 %v1910_v31 }
  0x70   :  { %1818 = vmatprep.mubr.bf16.mxu0 %v1911_v32  ;;  %1850 = vmatprep.mubr.bf16.mxu1 %v1912_v33 }
  0x77   :  { %1819 = vmatmul.mubr.bf16.gmra.mrb[24].mxu0 %v1913_v34  ;;  %1851 = vmatmul.mubr.bf16.gmra.mrb[24].mxu1 %v1914_v35 }
  0x78   :  { %1822 = vmatprep.mubr.bf16.mxu0 %v1915_v36  ;;  %1854 = vmatprep.mubr.bf16.mxu1 %v1916_v37 }
  0x7f   :  { %1823 = vmatmul.mubr.bf16.gmra.mrb[28].mxu0 %v1917_v38  ;;  %1855 = vmatmul.mubr.bf16.gmra.mrb[28].mxu1 %v1918_v39 }
 0x11a   :  { %v1796_v40 = vpop.f32.mrb[0].mxu0  ;;  %v1828_v41 = vpop.f32.mrb[0].mxu1 }
 0x11b   :  { %v527_v42 = vpop.f32.mrb[1].mxu0  ;;  %v655_v43 = vpop.f32.mrb[1].mxu1  ;;  %v979_v46 = vmax.f32 %v1796_v40, 0.0  ;;  %v1011_v47 = vmax.f32 %v1828_v41, 0.0 }
 0x11c   :  { %v1797_v44 = vpop.f32.mrb[2].mxu0  ;;  %v1829_v45 = vpop.f32.mrb[2].mxu1  ;;  %v977_v52 = vmax.f32 %v527_v42, 0.0  ;;  %v1009_v53 = vmax.f32 %v655_v43, 0.0 }
 0x11d   :  { %v980_v48 = vmax.f32 %v1797_v44, 0.0  ;;  %v1012_v49 = vmax.f32 %v1829_v45, 0.0  ;;  %v530_v50 = vpop.f32.mrb[3].mxu0  ;;  %v658_v51 = vpop.f32.mrb[3].mxu1 }
 0x11e   :  { %v978_v54 = vmax.f32 %v530_v50, 0.0  ;;  %v1010_v55 = vmax.f32 %v658_v51, 0.0 }
 0x11f   :  { %v1555_v56 = vpack.c.bf16 %v980_v48, %v979_v46  ;;  %v1635_v57 = vpack.c.bf16 %v1012_v49, %v1011_v47 }
 0x120   :  { %v1550_v58 = vpack.c.bf16 %v978_v54, %v977_v52  ;;  %v1630_v59 = vpack.c.bf16 %v1010_v55, %v1009_v53 }
 0x121   :  { %1707 = vst [vmem:[#allocation8 + $0x8] sm:$0xff] %v1555_v56   ;;  %1723 = vst [vmem:[#allocation8 + $0x88] sm:$0xff] %v1635_v57  }
 0x122   :  { %1551 = vst [vmem:[#allocation8] sm:$0xff] %v1550_v58   ;;  %1722 = vst [vmem:[#allocation8 + $0x80] sm:$0xff] %v1630_v59   ;;  %v1800_v60 = vpop.f32.mrb[4].mxu0  ;;  %v1832_v61 = vpop.f32.mrb[4].mxu1 }
 0x123   :  { %v543_v62 = vpop.f32.mrb[5].mxu0  ;;  %v671_v63 = vpop.f32.mrb[5].mxu1  ;;  %v983_v2 = vmax.f32 %v1800_v60, 0.0  ;;  %v1015_v3 = vmax.f32 %v1832_v61, 0.0 }
 0x124   :  { %v1801_v0 = vpop.f32.mrb[6].mxu0  ;;  %v1833_v1 = vpop.f32.mrb[6].mxu1  ;;  %v981_v8 = vmax.f32 %v543_v62, 0.0  ;;  %v1013_v9 = vmax.f32 %v671_v63, 0.0 }
 0x125   :  { %v984_v4 = vmax.f32 %v1801_v0, 0.0  ;;  %v1016_v5 = vmax.f32 %v1833_v1, 0.0  ;;  %v546_v6 = vpop.f32.mrb[7].mxu0  ;;  %v674_v7 = vpop.f32.mrb[7].mxu1 }
 0x126   :  { %v982_v10 = vmax.f32 %v546_v6, 0.0  ;;  %v1014_v11 = vmax.f32 %v674_v7, 0.0 }
 0x127   :  { %v1565_v12 = vpack.c.bf16 %v984_v4, %v983_v2  ;;  %v1645_v13 = vpack.c.bf16 %v1016_v5, %v1015_v3 }
 0x128   :  { %v1560_v14 = vpack.c.bf16 %v982_v10, %v981_v8  ;;  %v1640_v15 = vpack.c.bf16 %v1014_v11, %v1013_v9 }
 0x129   :  { %1709 = vst [vmem:[#allocation8 + $0x18] sm:$0xff] %v1565_v12   ;;  %1725 = vst [vmem:[#allocation8 + $0x98] sm:$0xff] %v1645_v13  }
 0x12a   :  { %1708 = vst [vmem:[#allocation8 + $0x10] sm:$0xff] %v1560_v14   ;;  %1724 = vst [vmem:[#allocation8 + $0x90] sm:$0xff] %v1640_v15   ;;  %v1804_v16 = vpop.f32.mrb[8].mxu0  ;;  %v1836_v17 = vpop.f32.mrb[8].mxu1 }
 0x12b   :  { %v559_v18 = vpop.f32.mrb[9].mxu0  ;;  %v687_v19 = vpop.f32.mrb[9].mxu1  ;;  %v987_v22 = vmax.f32 %v1804_v16, 0.0  ;;  %v1019_v23 = vmax.f32 %v1836_v17, 0.0 }
 0x12c   :  { %v1805_v20 = vpop.f32.mrb[10].mxu0  ;;  %v1837_v21 = vpop.f32.mrb[10].mxu1  ;;  %v985_v28 = vmax.f32 %v559_v18, 0.0  ;;  %v1017_v29 = vmax.f32 %v687_v19, 0.0 }
 0x12d   :  { %v988_v24 = vmax.f32 %v1805_v20, 0.0  ;;  %v1020_v25 = vmax.f32 %v1837_v21, 0.0  ;;  %v562_v26 = vpop.f32.mrb[11].mxu0  ;;  %v690_v27 = vpop.f32.mrb[11].mxu1 }
 0x12e   :  { %v986_v30 = vmax.f32 %v562_v26, 0.0  ;;  %v1018_v31 = vmax.f32 %v690_v27, 0.0 }
 0x12f   :  { %v1575_v32 = vpack.c.bf16 %v988_v24, %v987_v22  ;;  %v1655_v33 = vpack.c.bf16 %v1020_v25, %v1019_v23 }
 0x130   :  { %v1570_v34 = vpack.c.bf16 %v986_v30, %v985_v28  ;;  %v1650_v35 = vpack.c.bf16 %v1018_v31, %v1017_v29 }
 0x131   :  { %1711 = vst [vmem:[#allocation8 + $0x28] sm:$0xff] %v1575_v32   ;;  %1727 = vst [vmem:[#allocation8 + $0xa8] sm:$0xff] %v1655_v33  }
 0x132   :  { %1710 = vst [vmem:[#allocation8 + $0x20] sm:$0xff] %v1570_v34   ;;  %1726 = vst [vmem:[#allocation8 + $0xa0] sm:$0xff] %v1650_v35   ;;  %v1808_v36 = vpop.f32.mrb[12].mxu0  ;;  %v1840_v37 = vpop.f32.mrb[12].mxu1 }
 0x133   :  { %v575_v38 = vpop.f32.mrb[13].mxu0  ;;  %v703_v39 = vpop.f32.mrb[13].mxu1  ;;  %v991_v42 = vmax.f32 %v1808_v36, 0.0  ;;  %v1023_v43 = vmax.f32 %v1840_v37, 0.0 }
 0x134   :  { %v1809_v40 = vpop.f32.mrb[14].mxu0  ;;  %v1841_v41 = vpop.f32.mrb[14].mxu1  ;;  %v989_v48 = vmax.f32 %v575_v38, 0.0  ;;  %v1021_v49 = vmax.f32 %v703_v39, 0.0 }
 0x135   :  { %v992_v44 = vmax.f32 %v1809_v40, 0.0  ;;  %v1024_v45 = vmax.f32 %v1841_v41, 0.0  ;;  %v578_v46 = vpop.f32.mrb[15].mxu0  ;;  %v706_v47 = vpop.f32.mrb[15].mxu1 }
 0x136   :  { %v990_v50 = vmax.f32 %v578_v46, 0.0  ;;  %v1022_v51 = vmax.f32 %v706_v47, 0.0 }
 0x137   :  { %v1585_v52 = vpack.c.bf16 %v992_v44, %v991_v42  ;;  %v1665_v53 = vpack.c.bf16 %v1024_v45, %v1023_v43 }
 0x138   :  { %v1580_v54 = vpack.c.bf16 %v990_v50, %v989_v48  ;;  %v1660_v55 = vpack.c.bf16 %v1022_v51, %v1021_v49 }
 0x139   :  { %1713 = vst [vmem:[#allocation8 + $0x38] sm:$0xff] %v1585_v52   ;;  %1729 = vst [vmem:[#allocation8 + $0xb8] sm:$0xff] %v1665_v53  }
 0x13a   :  { %1712 = vst [vmem:[#allocation8 + $0x30] sm:$0xff] %v1580_v54   ;;  %1728 = vst [vmem:[#allocation8 + $0xb0] sm:$0xff] %v1660_v55   ;;  %v1812_v56 = vpop.f32.mrb[16].mxu0  ;;  %v1844_v57 = vpop.f32.mrb[16].mxu1 }
 0x13b   :  { %v591_v58 = vpop.f32.mrb[17].mxu0  ;;  %v719_v59 = vpop.f32.mrb[17].mxu1  ;;  %v995_v62 = vmax.f32 %v1812_v56, 0.0  ;;  %v1027_v63 = vmax.f32 %v1844_v57, 0.0 }
 0x13c   :  { %v1813_v60 = vpop.f32.mrb[18].mxu0  ;;  %v1845_v61 = vpop.f32.mrb[18].mxu1  ;;  %v993_v4 = vmax.f32 %v591_v58, 0.0  ;;  %v1025_v5 = vmax.f32 %v719_v59, 0.0 }
 0x13d   :  { %v996_v0 = vmax.f32 %v1813_v60, 0.0  ;;  %v1028_v1 = vmax.f32 %v1845_v61, 0.0  ;;  %v594_v2 = vpop.f32.mrb[19].mxu0  ;;  %v722_v3 = vpop.f32.mrb[19].mxu1 }
 0x13e   :  { %v994_v6 = vmax.f32 %v594_v2, 0.0  ;;  %v1026_v7 = vmax.f32 %v722_v3, 0.0 }
 0x13f   :  { %v1595_v8 = vpack.c.bf16 %v996_v0, %v995_v62  ;;  %v1675_v9 = vpack.c.bf16 %v1028_v1, %v1027_v63 }
 0x140   :  { %v1590_v10 = vpack.c.bf16 %v994_v6, %v993_v4  ;;  %v1670_v11 = vpack.c.bf16 %v1026_v7, %v1025_v5 }
 0x141   :  { %1715 = vst [vmem:[#allocation8 + $0x48] sm:$0xff] %v1595_v8   ;;  %1731 = vst [vmem:[#allocation8 + $0xc8] sm:$0xff] %v1675_v9  }
 0x142   :  { %1714 = vst [vmem:[#allocation8 + $0x40] sm:$0xff] %v1590_v10   ;;  %1730 = vst [vmem:[#allocation8 + $0xc0] sm:$0xff] %v1670_v11   ;;  %v1816_v12 = vpop.f32.mrb[20].mxu0  ;;  %v1848_v13 = vpop.f32.mrb[20].mxu1 }
 0x143   :  { %v607_v14 = vpop.f32.mrb[21].mxu0  ;;  %v735_v15 = vpop.f32.mrb[21].mxu1  ;;  %v999_v18 = vmax.f32 %v1816_v12, 0.0  ;;  %v1031_v19 = vmax.f32 %v1848_v13, 0.0 }
 0x144   :  { %v1817_v16 = vpop.f32.mrb[22].mxu0  ;;  %v1849_v17 = vpop.f32.mrb[22].mxu1  ;;  %v997_v24 = vmax.f32 %v607_v14, 0.0  ;;  %v1029_v25 = vmax.f32 %v735_v15, 0.0 }
 0x145   :  { %v1000_v20 = vmax.f32 %v1817_v16, 0.0  ;;  %v1032_v21 = vmax.f32 %v1849_v17, 0.0  ;;  %v610_v22 = vpop.f32.mrb[23].mxu0  ;;  %v738_v23 = vpop.f32.mrb[23].mxu1 }
 0x146   :  { %v998_v26 = vmax.f32 %v610_v22, 0.0  ;;  %v1030_v27 = vmax.f32 %v738_v23, 0.0 }
 0x147   :  { %v1605_v28 = vpack.c.bf16 %v1000_v20, %v999_v18  ;;  %v1685_v29 = vpack.c.bf16 %v1032_v21, %v1031_v19 }
 0x148   :  { %v1600_v30 = vpack.c.bf16 %v998_v26, %v997_v24  ;;  %v1680_v31 = vpack.c.bf16 %v1030_v27, %v1029_v25 }
 0x149   :  { %1717 = vst [vmem:[#allocation8 + $0x58] sm:$0xff] %v1605_v28   ;;  %1733 = vst [vmem:[#allocation8 + $0xd8] sm:$0xff] %v1685_v29  }
 0x14a   :  { %1716 = vst [vmem:[#allocation8 + $0x50] sm:$0xff] %v1600_v30   ;;  %1732 = vst [vmem:[#allocation8 + $0xd0] sm:$0xff] %v1680_v31   ;;  %v1820_v32 = vpop.f32.mrb[24].mxu0  ;;  %v1852_v33 = vpop.f32.mrb[24].mxu1 }
 0x14b   :  { %v623_v34 = vpop.f32.mrb[25].mxu0  ;;  %v751_v35 = vpop.f32.mrb[25].mxu1  ;;  %v1003_v38 = vmax.f32 %v1820_v32, 0.0  ;;  %v1035_v39 = vmax.f32 %v1852_v33, 0.0 }
 0x14c   :  { %v1821_v36 = vpop.f32.mrb[26].mxu0  ;;  %v1853_v37 = vpop.f32.mrb[26].mxu1  ;;  %v1001_v44 = vmax.f32 %v623_v34, 0.0  ;;  %v1033_v45 = vmax.f32 %v751_v35, 0.0 }
 0x14d   :  { %v1004_v40 = vmax.f32 %v1821_v36, 0.0  ;;  %v1036_v41 = vmax.f32 %v1853_v37, 0.0  ;;  %v626_v42 = vpop.f32.mrb[27].mxu0  ;;  %v754_v43 = vpop.f32.mrb[27].mxu1 }
 0x14e   :  { %v1002_v46 = vmax.f32 %v626_v42, 0.0  ;;  %v1034_v47 = vmax.f32 %v754_v43, 0.0 }
 0x14f   :  { %v1615_v48 = vpack.c.bf16 %v1004_v40, %v1003_v38  ;;  %v1695_v49 = vpack.c.bf16 %v1036_v41, %v1035_v39 }
 0x150   :  { %v1610_v50 = vpack.c.bf16 %v1002_v46, %v1001_v44  ;;  %v1690_v51 = vpack.c.bf16 %v1034_v47, %v1033_v45 }
 0x151   :  { %1719 = vst [vmem:[#allocation8 + $0x68] sm:$0xff] %v1615_v48   ;;  %1735 = vst [vmem:[#allocation8 + $0xe8] sm:$0xff] %v1695_v49  }
 0x152   :  { %1718 = vst [vmem:[#allocation8 + $0x60] sm:$0xff] %v1610_v50   ;;  %1734 = vst [vmem:[#allocation8 + $0xe0] sm:$0xff] %v1690_v51   ;;  %v1824_v52 = vpop.f32.mrb[28].mxu0  ;;  %v1856_v53 = vpop.f32.mrb[28].mxu1 }
 0x153   :  { %v639_v54 = vpop.f32.mrb[29].mxu0  ;;  %v767_v55 = vpop.f32.mrb[29].mxu1  ;;  %v1007_v58 = vmax.f32 %v1824_v52, 0.0  ;;  %v1039_v59 = vmax.f32 %v1856_v53, 0.0 }
 0x154   :  { %v1825_v56 = vpop.f32.mrb[30].mxu0  ;;  %v1857_v57 = vpop.f32.mrb[30].mxu1  ;;  %v1005_v0 = vmax.f32 %v639_v54, 0.0  ;;  %v1037_v1 = vmax.f32 %v767_v55, 0.0 }
 0x155   :  { %v1008_v60 = vmax.f32 %v1825_v56, 0.0  ;;  %v1040_v61 = vmax.f32 %v1857_v57, 0.0  ;;  %v642_v62 = vpop.f32.mrb[31].mxu0  ;;  %v770_v63 = vpop.f32.mrb[31].mxu1 }
 0x156   :  { %v1006_v2 = vmax.f32 %v642_v62, 0.0  ;;  %v1038_v3 = vmax.f32 %v770_v63, 0.0 }
 0x157   :  { %v1625_v4 = vpack.c.bf16 %v1008_v60, %v1007_v58  ;;  %v1705_v5 = vpack.c.bf16 %v1040_v61, %v1039_v59 }
 0x158   :  { %v1620_v6 = vpack.c.bf16 %v1006_v2, %v1005_v0  ;;  %v1700_v7 = vpack.c.bf16 %v1038_v3, %v1037_v1 }
 0x159   :  { %1721 = vst [vmem:[#allocation8 + $0x78] sm:$0xff] %v1625_v4   ;;  %1737 = vst [vmem:[#allocation8 + $0xf8] sm:$0xff] %v1705_v5  }
 0x15a   :  { %1720 = vst [vmem:[#allocation8 + $0x70] sm:$0xff] %v1620_v6   ;;  %1736 = vst [vmem:[#allocation8 + $0xf0] sm:$0xff] %v1700_v7  }
 0x15b   :  { %1974 = shalt.err (!%p1971_p6)
}
 0x15c   :  { %s1975_s10 = scalar_lea.hbm %s2058_s2, 4096 }
 0x15d   :  { %p1976_p7 = scmp.ne.s32.totalorder %s2058_s2, %s1975_s10  ;;  %p1979_p8 = scmp.lt.u32.totalorder %s1975_s10, %s2058_s2 }
 0x15f   :  { %p1981_p9 = pnand %p1979_p8, %p1976_p7 }
 0x161   :  { %1984 = shalt.err (!%p1981_p9)
}
 0x162   :  { %1372 = dma.vmem_to_hbm [thread:$0]  %s1367_s6, 4096, %s2058_s2, [#allocation5], %s1992_s19, %s1992_s19, %s1993_s20  }
 0x163   :  { %1989 = dma.done.wait [#allocation5], 4096  }
 0x164   :  { %1990 = vsyncadd [#allocation5], 4294963200 }
 0x165   :  { %1376 = vsyncpa [#allocation4], 1 }
 0x166   :  { %1377 = vsyncpa [#allocation7], 1 }
 0x167   :  { %1378 = vsyncpa [#allocation5], 1 }

</bundles_post_ra>
